<compile_context>
chip_gen: v6e
topology: v6e:2x2x1
jax: 0.10.0
libtpu: 0.0.40
codegen_flags: <defaults>
</compile_context>

<pallas_src>
import functools

import jax
import jax.numpy as jnp
from jax import lax
from jax.experimental import pallas as pl
from jax.experimental.pallas import tpu as pltpu


def _round_up(x, m):
    return (x + m - 1) // m * m


# --------------------------------------------------------------------------
# Kernel 1: GCN conv   H_tile = ReLU( Â_tile @ (XW) + b )
#   Â tile and XW are bf16 MXU operands, f32 accumulation, f32 elementwise.
# --------------------------------------------------------------------------
def gcn_conv_kernel(a_ref, xw_ref, b_ref, h_ref):
    h = jnp.dot(a_ref[...], xw_ref[...],
                preferred_element_type=jnp.float32) + b_ref[...]
    h_ref[...] = jnp.maximum(h, 0.0)


# --------------------------------------------------------------------------
# Kernel 2: per edge-tile |Hs-Hd|^p (f32), scatter-add via one-hot bf16 MXU
#   matmul into the resident output block, finalize with mean (precomputed
#   1/cnt) and tanh on the last grid step.
# --------------------------------------------------------------------------
def edge_scatter_kernel(hs_ref, hd_ref, src_ref, inv_ref, out_ref, *, p):
    t = pl.program_id(0)

    @pl.when(t == 0)
    def _():
        out_ref[...] = jnp.zeros_like(out_ref)

    diff = jnp.abs(hs_ref[...] - hd_ref[...])           # (TE, H_pad) f32
    if p == 2.0:
        feat = diff * diff
    else:
        feat = jnp.power(diff, jnp.float32(p))

    n_pad = out_ref.shape[0]
    te = src_ref.shape[1]
    row_ids = lax.broadcasted_iota(jnp.int32, (n_pad, te), 0)
    one_hot = jnp.where(row_ids == src_ref[...],
                        jnp.float32(1.0),
                        jnp.float32(0.0)).astype(jnp.bfloat16)  # (N_pad, TE)

    # MXU scatter-add: (N_pad, TE) @ (TE, H_pad) -> (N_pad, H_pad), f32 acc.
    out_ref[...] += jnp.dot(one_hot, feat.astype(jnp.bfloat16),
                            preferred_element_type=jnp.float32)

    @pl.when(t == pl.num_programs(0) - 1)
    def _():
        out_ref[...] = jnp.tanh(out_ref[...] * inv_ref[...])


# --------------------------------------------------------------------------
# Wrapper
# --------------------------------------------------------------------------
def edge_control(X, W, b, edge_index, *, p=2.0, te=256):
    """X: [N, F] f32, W: [F, H] f32, b: [H] f32, edge_index: [2, E] int32."""
    N, F = X.shape
    H = W.shape[1]
    src = edge_index[0].astype(jnp.int32)
    dst = edge_index[1].astype(jnp.int32)
    E = int(src.shape[0])

    # ---- padding: lane-dense hidden dim, 128-aligned node rows --------------
    H_pad = _round_up(H, 128)
    N_pad = _round_up(N, 128)
    tm = 256 if N_pad % 256 == 0 else 128          # 256-wide tiles for v6e/v7x
    E_pad = _round_up(max(E, 1), te)

    # ---- glue: normalized adjacency with self-loops (GCN) -------------------
    adj = jnp.zeros((N, N), jnp.float32).at[dst, src].add(1.0)
    adj = adj + jnp.eye(N, dtype=jnp.float32)
    deg = jnp.sum(adj, axis=1)
    dinv = jnp.where(deg > 0, lax.rsqrt(deg), 0.0)
    a_norm = dinv[:, None] * adj * dinv[None, :]
    a_bf = jnp.pad(a_norm, ((0, N_pad - N), (0, N_pad - N))).astype(jnp.bfloat16)

    # ---- glue: XW precomputed once (f32), rounded to bf16 for the MXU -------
    xw = jnp.dot(X.astype(jnp.float32), W.astype(jnp.float32),
                 precision=lax.Precision.HIGHEST)
    xw_bf = jnp.pad(xw, ((0, N_pad - N), (0, H_pad - H))).astype(jnp.bfloat16)
    b_p = jnp.pad(b.astype(jnp.float32), (0, H_pad - H)).reshape(1, H_pad)

    # ---- kernel 1: tiled GCN conv -------------------------------------------
    h = pl.pallas_call(
        gcn_conv_kernel,
        out_shape=jax.ShapeDtypeStruct((N_pad, H_pad), jnp.float32),
        grid=(N_pad // tm,),
        in_specs=[
            pl.BlockSpec((tm, N_pad), lambda i: (i, 0)),       # Â row tile
            pl.BlockSpec((N_pad, H_pad), lambda i: (0, 0)),    # XW (resident)
            pl.BlockSpec((1, H_pad), lambda i: (0, 0)),        # bias
        ],
        out_specs=pl.BlockSpec((tm, H_pad), lambda i: (i, 0)),
        compiler_params=pltpu.CompilerParams(
            dimension_semantics=("parallel",)),
    )(a_bf, xw_bf, b_p)

    # ---- glue: edge padding, endpoint pre-gather, per-src 1/count -----------
    # Padded edges use node 0 on both ends -> |Hs-Hd| = 0 -> contribute zero.
    src_p = jnp.pad(src, (0, E_pad - E))
    dst_p = jnp.pad(dst, (0, E_pad - E))
    hs = h[src_p]                                   # (E_pad, H_pad) f32 gather
    hd = h[dst_p]
    src_2d = src_p.reshape(1, E_pad)

    cnt = jnp.zeros((N,), jnp.float32).at[src].add(1.0)
    inv_cnt = jnp.where(cnt > 0, 1.0 / jnp.maximum(cnt, 1.0), 0.0)
    inv_cnt = jnp.pad(inv_cnt, (0, N_pad - N)).reshape(N_pad, 1)

    # ---- kernel 2: batched edge features + one-hot MXU scatter-mean + tanh --
    kernel2 = functools.partial(edge_scatter_kernel, p=p)
    out = pl.pallas_call(
        kernel2,
        out_shape=jax.ShapeDtypeStruct((N_pad, H_pad), jnp.float32),
        grid=(E_pad // te,),
        in_specs=[
            pl.BlockSpec((te, H_pad), lambda t: (t, 0)),       # Hs edge tile
            pl.BlockSpec((te, H_pad), lambda t: (t, 0)),       # Hd edge tile
            pl.BlockSpec((1, te), lambda t: (0, t)),           # src indices
            pl.BlockSpec((N_pad, 1), lambda t: (0, 0)),        # 1/cnt (resident)
        ],
        out_specs=pl.BlockSpec((N_pad, H_pad), lambda t: (0, 0)),  # accumulator
        compiler_params=pltpu.CompilerParams(
            dimension_semantics=("arbitrary",)),
    )(hs, hd, src_2d, inv_cnt)

    return out[:N, :H]


# --------------------------------------------------------------------------
# Pure-JAX reference (mirrors the kernel's bf16 MXU-operand rounding)
# --------------------------------------------------------------------------
def edge_control_reference(X, W, b, edge_index, *, p=2.0):
    N, F = X.shape
    H = W.shape[1]
    src = edge_index[0].astype(jnp.int32)
    dst = edge_index[1].astype(jnp.int32)

    adj = jnp.zeros((N, N), jnp.float32).at[dst, src].add(1.0)
    adj = adj + jnp.eye(N, dtype=jnp.float32)
    deg = jnp.sum(adj, axis=1)
    dinv = jnp.where(deg > 0, lax.rsqrt(deg), 0.0)
    a_norm = dinv[:, None] * adj * dinv[None, :]

    a32 = a_norm.astype(jnp.bfloat16).astype(jnp.float32)
    xw = jnp.dot(X.astype(jnp.float32), W.astype(jnp.float32),
                 precision=lax.Precision.HIGHEST)
    xw32 = xw.astype(jnp.bfloat16).astype(jnp.float32)
    hmat = jax.nn.relu(
        jnp.dot(a32, xw32, precision=lax.Precision.HIGHEST)
        + b[None, :].astype(jnp.float32))

    e_feat = jnp.abs(hmat[src] - hmat[dst]) ** p
    e_feat = e_feat.astype(jnp.bfloat16).astype(jnp.float32)  # kernel's scatter operand
    seg = jnp.zeros((N, H), jnp.float32).at[src].add(e_feat)
    cnt = jnp.zeros((N,), jnp.float32).at[src].add(1.0)
    mean = jnp.where(cnt[:, None] > 0, seg / jnp.maximum(cnt, 1.0)[:, None], 0.0)
    return jnp.tanh(mean)


if __name__ == "__main__":
    key = jax.random.PRNGKey(0)
    k_x, k_w, k_b, k_s, k_d = jax.random.split(key, 5)

    N, F, H, E = 256, 16, 32, 1024
    X = jax.random.normal(k_x, (N, F), jnp.float32)
    W = jax.random.normal(k_w, (F, H), jnp.float32) * 0.3
    b = jax.random.normal(k_b, (H,), jnp.float32) * 0.1
    src = jax.random.randint(k_s, (E,), 0, N, jnp.int32)
    dst = jax.random.randint(k_d, (E,), 0, N, jnp.int32)
    edge_index = jnp.stack([src, dst], axis=0)

    gg = edge_control(X, W, b, edge_index, p=2.0)
    gg = jax.block_until_ready(gg)

    ref = edge_control_reference(X, W, b, edge_index, p=2.0)
    assert gg.shape == (N, H)
    max_err = float(jnp.max(jnp.abs(gg - ref)))
    assert max_err < 2e-3, f"mismatch vs reference: max abs err {max_err}"

    print("KERNEL_OK")
</pallas_src>

<mosaic_0001>
module attributes {stable_mosaic.version = 11 : i64} {
  func.func @gcn_conv_kernel(%arg0: i32, %arg1: memref<256x256xbf16, #tpu.memory_space<vmem>>, %arg2: memref<256x128xbf16, #tpu.memory_space<vmem>>, %arg3: memref<1x128xf32, #tpu.memory_space<vmem>>, %arg4: memref<256x128xf32, #tpu.memory_space<vmem>>) attributes {dimension_semantics = [#tpu.dimension_semantics<parallel>], iteration_bounds = array<i64: 1>, scalar_prefetch = 0 : i64, scratch_operands = 0 : i64, tpu.core_type = #tpu.core_type<tc>, window_params = [{transform_indices = @transform_0, window_bounds = array<i64: 256, 256>}, {pipeline_mode = #tpu.pipeline_mode<synchronous>, transform_indices = @transform_1, window_bounds = array<i64: 256, 128>}, {pipeline_mode = #tpu.pipeline_mode<synchronous>, transform_indices = @transform_2, window_bounds = array<i64: 1, 128>}, {transform_indices = @transform_3, window_bounds = array<i64: 256, 128>}]} {
    %c0 = arith.constant 0 : index
    %c0_0 = arith.constant 0 : index
    %0 = vector.load %arg1[%c0, %c0_0] : memref<256x256xbf16, #tpu.memory_space<vmem>>, vector<256x256xbf16>
    %c0_1 = arith.constant 0 : index
    %c0_2 = arith.constant 0 : index
    %1 = vector.load %arg2[%c0_1, %c0_2] : memref<256x128xbf16, #tpu.memory_space<vmem>>, vector<256x128xbf16>
    %cst = arith.constant dense<0.000000e+00> : vector<256x128xf32>
    %2 = tpu.matmul %0, %1, %cst {dimension_numbers = #tpu.dot_dimension_numbers<[1], [0], [0], [1], [0, 0, 1, 1], [], []>} : vector<256x256xbf16>, vector<256x128xbf16>, vector<256x128xf32> -> vector<256x128xf32>
    %c0_3 = arith.constant 0 : index
    %c0_4 = arith.constant 0 : index
    %3 = vector.load %arg3[%c0_3, %c0_4] : memref<1x128xf32, #tpu.memory_space<vmem>>, vector<1x128xf32>
    %4 = vector.broadcast %3 : vector<1x128xf32> to vector<256x128xf32>
    %5 = arith.addf %2, %4 : vector<256x128xf32>
    %cst_5 = arith.constant 0.000000e+00 : f32
    %6 = vector.broadcast %cst_5 : f32 to vector<256x128xf32>
    %7 = arith.maximumf %5, %6 : vector<256x128xf32>
    %c0_6 = arith.constant 0 : index
    %c0_7 = arith.constant 0 : index
    %8 = vector.load %arg4[%c0_6, %c0_7] : memref<256x128xf32, #tpu.memory_space<vmem>>, vector<256x128xf32>
    tpu.vector_store %arg4[%c0_6, %c0_7], %7 {strides = array<i32>} : memref<256x128xf32, #tpu.memory_space<vmem>>, vector<256x128xf32>,
    return
  }
  func.func @transform_0(%arg0: i32) -> (i32, i32) {
    %c0_i32 = arith.constant 0 : i32
    %c0_i32_0 = arith.constant 0 : i32
    return %arg0, %c0_i32 : i32, i32
  }
  func.func @transform_1(%arg0: i32) -> (i32, i32) {
    %c0_i32 = arith.constant 0 : i32
    %c0_i32_0 = arith.constant 0 : i32
    %c0_i32_1 = arith.constant 0 : i32
    return %c0_i32, %c0_i32_0 : i32, i32
  }
  func.func @transform_2(%arg0: i32) -> (i32, i32) {
    %c0_i32 = arith.constant 0 : i32
    %c0_i32_0 = arith.constant 0 : i32
    %c0_i32_1 = arith.constant 0 : i32
    return %c0_i32, %c0_i32_0 : i32, i32
  }
  func.func @transform_3(%arg0: i32) -> (i32, i32) {
    %c0_i32 = arith.constant 0 : i32
    %c0_i32_0 = arith.constant 0 : i32
    return %arg0, %c0_i32 : i32, i32
  }
}

</mosaic_0001>

<bundles_post_ra>
// kernel: tpu_custom_call.1
= control target key start
LH: loop header
LB: loop body
LE: loop exit
PB: predicated region body
PF: predicated region fallthrough
CT: control target
= control target key end

     0   :  { %8 = vsyncpa [#allocation3], 0  ;;  %s1007_s0 = inlined_call_operand.hbm [shape: bf16[256,256], index: 0, kind: input, shape index: {}]   ;;  %s1008_s1 = inlined_call_operand.hbm [shape: bf16[256,128], index: 1, kind: input, shape index: {}]   ;;  %s1009_s2 = inlined_call_operand.vmem [shape: f32[1,128], index: 2, kind: input, shape index: {}]   ;;  %s1010_s3 = inlined_call_operand.hbm [shape: f32[256,128], index: 3, kind: output, shape index: {}]  }
   0x1   :  { %9 = vsyncpa [#allocation6], 0 }
   0x2   :  { %10 = vsyncpa [#allocation4], 0  ;;  %s928_s12 = smov [#allocation2]  }
   0x3   :  { %s16_s13 = sshll.u32 %s928_s12, 4  ;;  %s17_s13 = int_to_ptr.vmem [resolvable:$true] %s16_s13 }
   0x4   :  { %s870_s14 = scalar_lea.vmem %s17_s13, 4096  ;;  %p875_p1 = scmp.lt.s32.totalorder %s17_s13, %s17_s13 }
   0x5   :  { %p871_p0 = scmp.ne.s32.totalorder %s17_s13, %s870_s14  ;;  %p876_p2 = scmp.lt.s32.totalorder %s870_s14, %s870_s14 }
   0x7   :  { %p877_p3 = por %p876_p2, %p875_p1 }
   0x9   :  { %p878_p4 = pnand %p877_p3, %p871_p0 }
   0xb   :  { %881 = shalt.err (!%p878_p4)
}
   0xc   :  { %s929_s15 = smov 128   ;;  %s930_s16 = smov 8  }
   0xd   :  { %22 = dma.hbm_to_vmem [thread:$0]  %s1007_s0, 4096, %s17_s13, [#allocation3], %s929_s15, %s929_s15, %s930_s16  }
   0xe   :  { %s931_s19 = smov [#allocation5]  }
   0xf   :  { %s28_s20 = sshll.u32 %s931_s19, 4  ;;  %s29_s20 = int_to_ptr.vmem [resolvable:$true] %s28_s20 }
  0x10   :  { %s890_s21 = scalar_lea.vmem %s29_s20, 2048  ;;  %p895_p6 = scmp.lt.s32.totalorder %s29_s20, %s29_s20 }
  0x11   :  { %p891_p5 = scmp.ne.s32.totalorder %s29_s20, %s890_s21  ;;  %p896_p7 = scmp.lt.s32.totalorder %s890_s21, %s890_s21 }
  0x13   :  { %p897_p8 = por %p896_p7, %p895_p6 }
  0x15   :  { %p898_p9 = pnand %p897_p8, %p891_p5 }
  0x17   :  { %901 = shalt.err (!%p898_p9)
}
  0x18   :  { %s932_s22 = smov 64   ;;  %s933_s23 = smov 4  }
  0x19   :  { %34 = dma.hbm_to_vmem [thread:$0]  %s1008_s1, 2048, %s29_s20, [#allocation6], %s932_s22, %s932_s22, %s933_s23  }
  0x1a   :  { %922 = dma.done.wait [#allocation3], 4096  }
  0x1b   :  { %923 = vsyncadd [#allocation3], 4294963200 }
  0x1c   :  { %924 = dma.done.wait [#allocation6], 2048  }
  0x1d   :  { %925 = vsyncadd [#allocation6], 4294965248  ;;  %v798_v0 = vld [vmem:[#allocation5 + $0x78] sm:$0xff]   ;;  %v800_v2 = vld [vmem:[#allocation5 + $0x70] sm:$0xff]  }
  0x1e   :  { %v799_v1 = vld [vmem:[#allocation5 + $0x38] sm:$0xff]   ;;  %663 = vmatprep.subr.bf16.mxu0 %v798_v0  ;;  %775 = vmatprep.subr.bf16.mxu1 %v798_v0  ;;  %v801_v3 = vld [vmem:[#allocation5 + $0x30] sm:$0xff]   ;;  %v802_v4 = vld [vmem:[#allocation5 + $0x68] sm:$0xff]  }
  0x1f   :  { %664 = vmatpush3.bf16.msra.mxu0 %v799_v1  ;;  %783 = vmatpush3.bf16.msra.mxu1 %v799_v1  ;;  %v803_v5 = vld [vmem:[#allocation5 + $0x28] sm:$0xff]   ;;  %v804_v6 = vld [vmem:[#allocation5 + $0x60] sm:$0xff]   ;;  %v806_v8 = vld [vmem:[#allocation5 + $0x58] sm:$0xff]  }
  0x20   :  { %665 = vmatprep.subr.bf16.mxu0 %v800_v2  ;;  %776 = vmatprep.subr.bf16.mxu1 %v800_v2  ;;  %v805_v7 = vld [vmem:[#allocation5 + $0x20] sm:$0xff]   ;;  %v807_v9 = vld [vmem:[#allocation5 + $0x18] sm:$0xff]   ;;  %v808_v10 = vld [vmem:[#allocation5 + $0x50] sm:$0xff]  }
  0x21   :  { %v816_v11 = vld [vmem:[#allocation2 + $0x4] ss:$8 sps:$4 sm:$0xff]   ;;  %v809_v13 = vld [vmem:[#allocation5 + $0x10] sm:$0xff]   ;;  %v814_v18 = vld [vmem:[#allocation2] ss:$8 sps:$4 sm:$0xff]  }
  0x22   :  { %v819_v12 = vld [vmem:[#allocation2 + $0x84] ss:$8 sps:$4 sm:$0xff]   ;;  %403 = vmatprep.mubr.bf16.mxu0 %v816_v11  ;;  %v817_v19 = vld [vmem:[#allocation2 + $0x80] ss:$8 sps:$4 sm:$0xff]   ;;  %v820_v20 = vld [vmem:[#allocation2 + $0x14] ss:$8 sps:$4 sm:$0xff]  }
  0x23   :  { %666 = vmatpush3.bf16.msra.mxu0 %v801_v3  ;;  %784 = vmatpush3.bf16.msra.mxu1 %v801_v3  ;;  %v810_v14 = vld [vmem:[#allocation5 + $0x48] sm:$0xff]   ;;  %v812_v16 = vld [vmem:[#allocation5 + $0x40] sm:$0xff]   ;;  %v822_v21 = vld [vmem:[#allocation2 + $0x94] ss:$8 sps:$4 sm:$0xff]  }
  0x24   :  { %667 = vmatprep.subr.bf16.mxu0 %v802_v4  ;;  %777 = vmatprep.subr.bf16.mxu1 %v802_v4  ;;  %v811_v15 = vld [vmem:[#allocation5 + $0x8] sm:$0xff]   ;;  %v813_v17 = vld [vmem:[#allocation5] sm:$0xff]   ;;  %v824_v22 = vld [vmem:[#allocation2 + $0x10] ss:$8 sps:$4 sm:$0xff]  }
  0x25   :  { %467 = vmatprep.mubr.bf16.mxu1 %v819_v12  ;;  %v825_v23 = vld [vmem:[#allocation2 + $0x90] ss:$8 sps:$4 sm:$0xff]   ;;  %v826_v24 = vld [vmem:[#allocation2 + $0x24] ss:$8 sps:$4 sm:$0xff]   ;;  %v830_v26 = vld [vmem:[#allocation2 + $0x20] ss:$8 sps:$4 sm:$0xff]  }
  0x26   :  { %v828_v25 = vld [vmem:[#allocation2 + $0xa4] ss:$8 sps:$4 sm:$0xff]   ;;  %v831_v27 = vld [vmem:[#allocation2 + $0xa0] ss:$8 sps:$4 sm:$0xff]   ;;  %v832_v28 = vld [vmem:[#allocation2 + $0x34] ss:$8 sps:$4 sm:$0xff]  }
  0x27   :  { %668 = vmatpush3.bf16.msra.mxu0 %v803_v5  ;;  %785 = vmatpush3.bf16.msra.mxu1 %v803_v5  ;;  %v834_v29 = vld [vmem:[#allocation2 + $0xb4] ss:$8 sps:$4 sm:$0xff]   ;;  %v836_v30 = vld [vmem:[#allocation2 + $0x30] ss:$8 sps:$4 sm:$0xff]   ;;  %v838_v32 = vld [vmem:[#allocation2 + $0x44] ss:$8 sps:$4 sm:$0xff]  }
  0x28   :  { %669 = vmatprep.subr.bf16.mxu0 %v804_v6  ;;  %778 = vmatprep.subr.bf16.mxu1 %v804_v6  ;;  %v837_v31 = vld [vmem:[#allocation2 + $0xb0] ss:$8 sps:$4 sm:$0xff]   ;;  %v840_v33 = vld [vmem:[#allocation2 + $0xc4] ss:$8 sps:$4 sm:$0xff]   ;;  %v842_v34 = vld [vmem:[#allocation2 + $0x40] ss:$8 sps:$4 sm:$0xff]  }
  0x29   :  { %v843_v35 = vld [vmem:[#allocation2 + $0xc0] ss:$8 sps:$4 sm:$0xff]   ;;  %v844_v36 = vld [vmem:[#allocation2 + $0x54] ss:$8 sps:$4 sm:$0xff]   ;;  %v848_v38 = vld [vmem:[#allocation2 + $0x50] ss:$8 sps:$4 sm:$0xff]  }
  0x2a   :  { %v846_v37 = vld [vmem:[#allocation2 + $0xd4] ss:$8 sps:$4 sm:$0xff]   ;;  %v849_v39 = vld [vmem:[#allocation2 + $0xd0] ss:$8 sps:$4 sm:$0xff]   ;;  %v850_v40 = vld [vmem:[#allocation2 + $0x64] ss:$8 sps:$4 sm:$0xff]  }
  0x2b   :  { %670 = vmatpush3.bf16.msra.mxu0 %v805_v7  ;;  %786 = vmatpush3.bf16.msra.mxu1 %v805_v7  ;;  %v852_v41 = vld [vmem:[#allocation2 + $0xe4] ss:$8 sps:$4 sm:$0xff]   ;;  %v854_v42 = vld [vmem:[#allocation2 + $0x60] ss:$8 sps:$4 sm:$0xff]   ;;  %v856_v44 = vld [vmem:[#allocation2 + $0x74] ss:$8 sps:$4 sm:$0xff]  }
  0x2c   :  { %671 = vmatprep.subr.bf16.mxu0 %v806_v8  ;;  %779 = vmatprep.subr.bf16.mxu1 %v806_v8  ;;  %v855_v43 = vld [vmem:[#allocation2 + $0xe0] ss:$8 sps:$4 sm:$0xff]   ;;  %v858_v45 = vld [vmem:[#allocation2 + $0xf4] ss:$8 sps:$4 sm:$0xff]   ;;  %v860_v46 = vld [vmem:[#allocation2 + $0x70] ss:$8 sps:$4 sm:$0xff]  }
  0x2d   :  { %v861_v47 = vld [vmem:[#allocation2 + $0xf0] ss:$8 sps:$4 sm:$0xff]   ;;  %v967_v50 = vld [vmem:[%s1009_s2] ss:$0 sm:$0xff]  ;;  %s934_s2 = smov [#allocation7]  }
  0x2e   :  { %s601_s26 = sshll.u32 %s934_s2, 4  ;;  %s602_s26 = int_to_ptr.vmem [resolvable:$true] %s601_s26 }
  0x2f   :  { %672 = vmatpush3.bf16.msra.mxu0 %v807_v9  ;;  %787 = vmatpush3.bf16.msra.mxu1 %v807_v9  ;;  %s902_s27 = scalar_lea.vmem %s602_s26, 4096  ;;  %p907_p11 = scmp.lt.s32.totalorder %s602_s26, %s602_s26 }
  0x30   :  { %673 = vmatprep.subr.bf16.mxu0 %v808_v10  ;;  %780 = vmatprep.subr.bf16.mxu1 %v808_v10  ;;  %p903_p10 = scmp.ne.s32.totalorder %s602_s26, %s902_s27  ;;  %p908_p12 = scmp.lt.s32.totalorder %s902_s27, %s902_s27 }
  0x32   :  { %p909_p13 = por %p908_p12, %p907_p11 }
  0x33   :  { %674 = vmatpush3.bf16.msra.mxu0 %v809_v13  ;;  %788 = vmatpush3.bf16.msra.mxu1 %v809_v13 }
  0x34   :  { %675 = vmatprep.subr.bf16.mxu0 %v810_v14  ;;  %781 = vmatprep.subr.bf16.mxu1 %v810_v14  ;;  %p910_p0 = pnand %p909_p13, %p903_p10 }
  0x37   :  { %676 = vmatpush3.bf16.msra.mxu0 %v811_v15  ;;  %789 = vmatpush3.bf16.msra.mxu1 %v811_v15 }
  0x38   :  { %677 = vmatprep.subr.bf16.mxu0 %v812_v16  ;;  %782 = vmatprep.subr.bf16.mxu1 %v812_v16 }
  0x3b   :  { %678 = vmatpush3.bf16.msra.mxu0 %v813_v17  ;;  %790 = vmatpush3.bf16.msra.mxu1 %v813_v17 }
  0x3e   :  { %404 = vmatmul.mubr.bf16.vlgmr.msra.gmra.mxu0 %v814_v18  ;;  %468 = vmatmul.mubr.bf16.vlgmr.msra.gmra.mxu1 %v817_v19 }
  0x3f   :  { %411 = vmatprep.mubr.bf16.mxu0 %v820_v20  ;;  %475 = vmatprep.mubr.bf16.mxu1 %v822_v21 }
  0x46   :  { %412 = vmatmul.mubr.bf16.gmra.mxu0 %v824_v22  ;;  %476 = vmatmul.mubr.bf16.gmra.mxu1 %v825_v23 }
  0x47   :  { %419 = vmatprep.mubr.bf16.mxu0 %v826_v24  ;;  %483 = vmatprep.mubr.bf16.mxu1 %v828_v25 }
  0x4e   :  { %420 = vmatmul.mubr.bf16.gmra.mxu0 %v830_v26  ;;  %484 = vmatmul.mubr.bf16.gmra.mxu1 %v831_v27 }
  0x4f   :  { %427 = vmatprep.mubr.bf16.mxu0 %v832_v28  ;;  %491 = vmatprep.mubr.bf16.mxu1 %v834_v29 }
  0x56   :  { %428 = vmatmul.mubr.bf16.gmra.mxu0 %v836_v30  ;;  %492 = vmatmul.mubr.bf16.gmra.mxu1 %v837_v31 }
  0x57   :  { %435 = vmatprep.mubr.bf16.mxu0 %v838_v32  ;;  %499 = vmatprep.mubr.bf16.mxu1 %v840_v33 }
  0x5e   :  { %436 = vmatmul.mubr.bf16.gmra.mxu0 %v842_v34  ;;  %500 = vmatmul.mubr.bf16.gmra.mxu1 %v843_v35 }
  0x5f   :  { %443 = vmatprep.mubr.bf16.mxu0 %v844_v36  ;;  %507 = vmatprep.mubr.bf16.mxu1 %v846_v37 }
  0x66   :  { %444 = vmatmul.mubr.bf16.gmra.mxu0 %v848_v38  ;;  %508 = vmatmul.mubr.bf16.gmra.mxu1 %v849_v39 }
  0x67   :  { %451 = vmatprep.mubr.bf16.mxu0 %v850_v40  ;;  %515 = vmatprep.mubr.bf16.mxu1 %v852_v41 }
  0x6e   :  { %452 = vmatmul.mubr.bf16.gmra.mxu0 %v854_v42  ;;  %516 = vmatmul.mubr.bf16.gmra.mxu1 %v855_v43 }
  0x6f   :  { %459 = vmatprep.mubr.bf16.mxu0 %v856_v44  ;;  %523 = vmatprep.mubr.bf16.mxu1 %v858_v45 }
  0x76   :  { %460 = vmatmul.mubr.bf16.gmra.mxu0 %v860_v46  ;;  %524 = vmatmul.mubr.bf16.gmra.mxu1 %v861_v47 }
  0xfe   :  { %v679_v48 = vpop.f32.mrf.mxu0  ;;  %v727_v49 = vpop.f32.mrf.mxu1 }
 0x100   :  { %v680_v51 = vpop.f32.mrf.mxu0  ;;  %v728_v52 = vpop.f32.mrf.mxu1 }
 0x101   :  { %v681_v53 = vadd.f32 %v680_v51, %v679_v48  ;;  %v729_v54 = vadd.f32 %v728_v52, %v727_v49 }
 0x102   :  { %v682_v55 = vpop.f32.mrf.mxu0  ;;  %v730_v56 = vpop.f32.mrf.mxu1 }
 0x103   :  { %v406_v57 = vadd.f32 %v681_v53, %v967_v50  ;;  %v470_v58 = vadd.f32 %v729_v54, %v967_v50 }
 0x104   :  { %v683_v59 = vpop.f32.mrf.mxu0  ;;  %v731_v60 = vpop.f32.mrf.mxu1 }
 0x105   :  { %v532_v61 = vmax.f32 %v406_v57, 0.0  ;;  %v548_v62 = vmax.f32 %v470_v58, 0.0  ;;  %v684_v63 = vadd.f32 %v683_v59, %v682_v55  ;;  %v732_v0 = vadd.f32 %v731_v60, %v730_v56 }
 0x106   :  { %v685_v1 = vpop.f32.mrf.mxu0  ;;  %v733_v2 = vpop.f32.mrf.mxu1 }
 0x107   :  { %564 = vst [vmem:[#allocation7] sm:$0xff] %v532_v61  ;;  %580 = vst [vmem:[#allocation7 + $0x80] sm:$0xff] %v548_v62  ;;  %v409_v3 = vadd.f32 %v684_v63, %v967_v50  ;;  %v473_v4 = vadd.f32 %v732_v0, %v967_v50 }
 0x108   :  { %v686_v5 = vpop.f32.mrf.mxu0  ;;  %v734_v6 = vpop.f32.mrf.mxu1 }
 0x109   :  { %v533_v7 = vmax.f32 %v409_v3, 0.0  ;;  %v549_v8 = vmax.f32 %v473_v4, 0.0  ;;  %v687_v9 = vadd.f32 %v686_v5, %v685_v1  ;;  %v735_v10 = vadd.f32 %v734_v6, %v733_v2 }
 0x10a   :  { %v688_v11 = vpop.f32.mrf.mxu0  ;;  %v736_v12 = vpop.f32.mrf.mxu1 }
 0x10b   :  { %565 = vst [vmem:[#allocation7 + $0x8] sm:$0xff] %v533_v7  ;;  %581 = vst [vmem:[#allocation7 + $0x88] sm:$0xff] %v549_v8  ;;  %v414_v13 = vadd.f32 %v687_v9, %v967_v50  ;;  %v478_v14 = vadd.f32 %v735_v10, %v967_v50 }
 0x10c   :  { %v689_v15 = vpop.f32.mrf.mxu0  ;;  %v737_v16 = vpop.f32.mrf.mxu1 }
 0x10d   :  { %v534_v17 = vmax.f32 %v414_v13, 0.0  ;;  %v550_v18 = vmax.f32 %v478_v14, 0.0  ;;  %v690_v19 = vadd.f32 %v689_v15, %v688_v11  ;;  %v738_v20 = vadd.f32 %v737_v16, %v736_v12 }
 0x10e   :  { %v691_v21 = vpop.f32.mrf.mxu0  ;;  %v739_v22 = vpop.f32.mrf.mxu1 }
 0x10f   :  { %566 = vst [vmem:[#allocation7 + $0x10] sm:$0xff] %v534_v17  ;;  %582 = vst [vmem:[#allocation7 + $0x90] sm:$0xff] %v550_v18  ;;  %v417_v23 = vadd.f32 %v690_v19, %v967_v50  ;;  %v481_v24 = vadd.f32 %v738_v20, %v967_v50 }
 0x110   :  { %v692_v25 = vpop.f32.mrf.mxu0  ;;  %v740_v26 = vpop.f32.mrf.mxu1 }
 0x111   :  { %v535_v27 = vmax.f32 %v417_v23, 0.0  ;;  %v551_v28 = vmax.f32 %v481_v24, 0.0  ;;  %v693_v29 = vadd.f32 %v692_v25, %v691_v21  ;;  %v741_v30 = vadd.f32 %v740_v26, %v739_v22 }
 0x112   :  { %v694_v31 = vpop.f32.mrf.mxu0  ;;  %v742_v32 = vpop.f32.mrf.mxu1 }
 0x113   :  { %567 = vst [vmem:[#allocation7 + $0x18] sm:$0xff] %v535_v27  ;;  %583 = vst [vmem:[#allocation7 + $0x98] sm:$0xff] %v551_v28  ;;  %v422_v33 = vadd.f32 %v693_v29, %v967_v50  ;;  %v486_v34 = vadd.f32 %v741_v30, %v967_v50 }
 0x114   :  { %v695_v35 = vpop.f32.mrf.mxu0  ;;  %v743_v36 = vpop.f32.mrf.mxu1 }
 0x115   :  { %v536_v37 = vmax.f32 %v422_v33, 0.0  ;;  %v552_v38 = vmax.f32 %v486_v34, 0.0  ;;  %v696_v39 = vadd.f32 %v695_v35, %v694_v31  ;;  %v744_v40 = vadd.f32 %v743_v36, %v742_v32 }
 0x116   :  { %v697_v41 = vpop.f32.mrf.mxu0  ;;  %v745_v42 = vpop.f32.mrf.mxu1 }
 0x117   :  { %568 = vst [vmem:[#allocation7 + $0x20] sm:$0xff] %v536_v37  ;;  %584 = vst [vmem:[#allocation7 + $0xa0] sm:$0xff] %v552_v38  ;;  %v425_v43 = vadd.f32 %v696_v39, %v967_v50  ;;  %v489_v44 = vadd.f32 %v744_v40, %v967_v50 }
 0x118   :  { %v698_v45 = vpop.f32.mrf.mxu0  ;;  %v746_v46 = vpop.f32.mrf.mxu1 }
 0x119   :  { %v537_v47 = vmax.f32 %v425_v43, 0.0  ;;  %v553_v48 = vmax.f32 %v489_v44, 0.0  ;;  %v699_v49 = vadd.f32 %v698_v45, %v697_v41  ;;  %v747_v51 = vadd.f32 %v746_v46, %v745_v42 }
 0x11a   :  { %v700_v52 = vpop.f32.mrf.mxu0  ;;  %v748_v53 = vpop.f32.mrf.mxu1 }
 0x11b   :  { %569 = vst [vmem:[#allocation7 + $0x28] sm:$0xff] %v537_v47  ;;  %585 = vst [vmem:[#allocation7 + $0xa8] sm:$0xff] %v553_v48  ;;  %v430_v54 = vadd.f32 %v699_v49, %v967_v50  ;;  %v494_v55 = vadd.f32 %v747_v51, %v967_v50 }
 0x11c   :  { %v701_v56 = vpop.f32.mrf.mxu0  ;;  %v749_v57 = vpop.f32.mrf.mxu1 }
 0x11d   :  { %v538_v58 = vmax.f32 %v430_v54, 0.0  ;;  %v554_v59 = vmax.f32 %v494_v55, 0.0  ;;  %v702_v60 = vadd.f32 %v701_v56, %v700_v52  ;;  %v750_v61 = vadd.f32 %v749_v57, %v748_v53 }
 0x11e   :  { %v703_v62 = vpop.f32.mrf.mxu0  ;;  %v751_v63 = vpop.f32.mrf.mxu1 }
 0x11f   :  { %570 = vst [vmem:[#allocation7 + $0x30] sm:$0xff] %v538_v58  ;;  %586 = vst [vmem:[#allocation7 + $0xb0] sm:$0xff] %v554_v59  ;;  %v433_v0 = vadd.f32 %v702_v60, %v967_v50  ;;  %v497_v1 = vadd.f32 %v750_v61, %v967_v50 }
 0x120   :  { %v704_v2 = vpop.f32.mrf.mxu0  ;;  %v752_v3 = vpop.f32.mrf.mxu1 }
 0x121   :  { %v539_v4 = vmax.f32 %v433_v0, 0.0  ;;  %v555_v5 = vmax.f32 %v497_v1, 0.0  ;;  %v705_v6 = vadd.f32 %v704_v2, %v703_v62  ;;  %v753_v7 = vadd.f32 %v752_v3, %v751_v63 }
 0x122   :  { %v706_v8 = vpop.f32.mrf.mxu0  ;;  %v754_v9 = vpop.f32.mrf.mxu1 }
 0x123   :  { %571 = vst [vmem:[#allocation7 + $0x38] sm:$0xff] %v539_v4  ;;  %587 = vst [vmem:[#allocation7 + $0xb8] sm:$0xff] %v555_v5  ;;  %v438_v10 = vadd.f32 %v705_v6, %v967_v50  ;;  %v502_v11 = vadd.f32 %v753_v7, %v967_v50 }
 0x124   :  { %v707_v12 = vpop.f32.mrf.mxu0  ;;  %v755_v13 = vpop.f32.mrf.mxu1 }
 0x125   :  { %v540_v14 = vmax.f32 %v438_v10, 0.0  ;;  %v556_v15 = vmax.f32 %v502_v11, 0.0  ;;  %v708_v16 = vadd.f32 %v707_v12, %v706_v8  ;;  %v756_v17 = vadd.f32 %v755_v13, %v754_v9 }
 0x126   :  { %v709_v18 = vpop.f32.mrf.mxu0  ;;  %v757_v19 = vpop.f32.mrf.mxu1 }
 0x127   :  { %572 = vst [vmem:[#allocation7 + $0x40] sm:$0xff] %v540_v14  ;;  %588 = vst [vmem:[#allocation7 + $0xc0] sm:$0xff] %v556_v15  ;;  %v441_v20 = vadd.f32 %v708_v16, %v967_v50  ;;  %v505_v21 = vadd.f32 %v756_v17, %v967_v50 }
 0x128   :  { %v710_v22 = vpop.f32.mrf.mxu0  ;;  %v758_v23 = vpop.f32.mrf.mxu1 }
 0x129   :  { %v541_v24 = vmax.f32 %v441_v20, 0.0  ;;  %v557_v25 = vmax.f32 %v505_v21, 0.0  ;;  %v711_v26 = vadd.f32 %v710_v22, %v709_v18  ;;  %v759_v27 = vadd.f32 %v758_v23, %v757_v19 }
 0x12a   :  { %v712_v28 = vpop.f32.mrf.mxu0  ;;  %v760_v29 = vpop.f32.mrf.mxu1 }
 0x12b   :  { %573 = vst [vmem:[#allocation7 + $0x48] sm:$0xff] %v541_v24  ;;  %589 = vst [vmem:[#allocation7 + $0xc8] sm:$0xff] %v557_v25  ;;  %v446_v30 = vadd.f32 %v711_v26, %v967_v50  ;;  %v510_v31 = vadd.f32 %v759_v27, %v967_v50 }
 0x12c   :  { %v713_v32 = vpop.f32.mrf.mxu0  ;;  %v761_v33 = vpop.f32.mrf.mxu1 }
 0x12d   :  { %v542_v34 = vmax.f32 %v446_v30, 0.0  ;;  %v558_v35 = vmax.f32 %v510_v31, 0.0  ;;  %v714_v36 = vadd.f32 %v713_v32, %v712_v28  ;;  %v762_v37 = vadd.f32 %v761_v33, %v760_v29 }
 0x12e   :  { %v715_v38 = vpop.f32.mrf.mxu0  ;;  %v763_v39 = vpop.f32.mrf.mxu1 }
 0x12f   :  { %574 = vst [vmem:[#allocation7 + $0x50] sm:$0xff] %v542_v34  ;;  %590 = vst [vmem:[#allocation7 + $0xd0] sm:$0xff] %v558_v35  ;;  %v449_v40 = vadd.f32 %v714_v36, %v967_v50  ;;  %v513_v41 = vadd.f32 %v762_v37, %v967_v50 }
 0x130   :  { %v716_v42 = vpop.f32.mrf.mxu0  ;;  %v764_v43 = vpop.f32.mrf.mxu1 }
 0x131   :  { %v543_v44 = vmax.f32 %v449_v40, 0.0  ;;  %v559_v45 = vmax.f32 %v513_v41, 0.0  ;;  %v717_v46 = vadd.f32 %v716_v42, %v715_v38  ;;  %v765_v47 = vadd.f32 %v764_v43, %v763_v39 }
 0x132   :  { %v718_v48 = vpop.f32.mrf.mxu0  ;;  %v766_v49 = vpop.f32.mrf.mxu1 }
 0x133   :  { %575 = vst [vmem:[#allocation7 + $0x58] sm:$0xff] %v543_v44  ;;  %591 = vst [vmem:[#allocation7 + $0xd8] sm:$0xff] %v559_v45  ;;  %v454_v51 = vadd.f32 %v717_v46, %v967_v50  ;;  %v518_v52 = vadd.f32 %v765_v47, %v967_v50 }
 0x134   :  { %v719_v53 = vpop.f32.mrf.mxu0  ;;  %v767_v54 = vpop.f32.mrf.mxu1 }
 0x135   :  { %v544_v55 = vmax.f32 %v454_v51, 0.0  ;;  %v560_v56 = vmax.f32 %v518_v52, 0.0  ;;  %v720_v57 = vadd.f32 %v719_v53, %v718_v48  ;;  %v768_v58 = vadd.f32 %v767_v54, %v766_v49 }
 0x136   :  { %v721_v59 = vpop.f32.mrf.mxu0  ;;  %v769_v60 = vpop.f32.mrf.mxu1 }
 0x137   :  { %576 = vst [vmem:[#allocation7 + $0x60] sm:$0xff] %v544_v55  ;;  %592 = vst [vmem:[#allocation7 + $0xe0] sm:$0xff] %v560_v56  ;;  %v457_v61 = vadd.f32 %v720_v57, %v967_v50  ;;  %v521_v62 = vadd.f32 %v768_v58, %v967_v50 }
 0x138   :  { %v722_v63 = vpop.f32.mrf.mxu0  ;;  %v770_v0 = vpop.f32.mrf.mxu1 }
 0x139   :  { %v545_v1 = vmax.f32 %v457_v61, 0.0  ;;  %v561_v2 = vmax.f32 %v521_v62, 0.0  ;;  %v723_v3 = vadd.f32 %v722_v63, %v721_v59  ;;  %v771_v4 = vadd.f32 %v770_v0, %v769_v60 }
 0x13a   :  { %v724_v5 = vpop.f32.mrf.mxu0  ;;  %v772_v6 = vpop.f32.mrf.mxu1 }
 0x13b   :  { %577 = vst [vmem:[#allocation7 + $0x68] sm:$0xff] %v545_v1  ;;  %593 = vst [vmem:[#allocation7 + $0xe8] sm:$0xff] %v561_v2  ;;  %v462_v7 = vadd.f32 %v723_v3, %v967_v50  ;;  %v526_v8 = vadd.f32 %v771_v4, %v967_v50 }
 0x13c   :  { %v725_v9 = vpop.f32.mrf.mxu0  ;;  %v773_v10 = vpop.f32.mrf.mxu1 }
 0x13d   :  { %v546_v11 = vmax.f32 %v462_v7, 0.0  ;;  %v562_v12 = vmax.f32 %v526_v8, 0.0  ;;  %v726_v13 = vadd.f32 %v725_v9, %v724_v5  ;;  %v774_v14 = vadd.f32 %v773_v10, %v772_v6 }
 0x13f   :  { %578 = vst [vmem:[#allocation7 + $0x70] sm:$0xff] %v546_v11  ;;  %594 = vst [vmem:[#allocation7 + $0xf0] sm:$0xff] %v562_v12  ;;  %v465_v15 = vadd.f32 %v726_v13, %v967_v50  ;;  %v529_v16 = vadd.f32 %v774_v14, %v967_v50 }
 0x141   :  { %v547_v17 = vmax.f32 %v465_v15, 0.0  ;;  %v563_v18 = vmax.f32 %v529_v16, 0.0 }
 0x143   :  { %579 = vst [vmem:[#allocation7 + $0x78] sm:$0xff] %v547_v17  ;;  %595 = vst [vmem:[#allocation7 + $0xf8] sm:$0xff] %v563_v18 }
 0x144   :  { %913 = shalt.err (!%p910_p0)
}
 0x145   :  { %607 = dma.vmem_to_hbm [thread:$0]  %s602_s26, 4096, %s1010_s3, [#allocation4], %s929_s15, %s929_s15, %s930_s16  }
 0x146   :  { %926 = dma.done.wait [#allocation4], 4096  }
 0x147   :  { %927 = vsyncadd [#allocation4], 4294963200 }
 0x148   :  { %611 = vsyncpa [#allocation3], 1 }
 0x149   :  { %612 = vsyncpa [#allocation6], 1 }
 0x14a   :  { %613 = vsyncpa [#allocation4], 1 }

</bundles_post_ra>
